<compile_context>
chip_gen: v5e
topology: v5e:2x2
jax: 0.10.0
libtpu: 0.0.40
codegen_flags: <defaults>
</compile_context>

<pallas_src>
import jax
import jax.numpy as jnp
from jax.experimental import pallas as pl
from jax.experimental.pallas import tpu as pltpu


def _round_up(x, m):
    return (x + m - 1) // m * m


def _make_kernel(offsets, m_out):
    """offsets: static row offsets (one per 3x3 tap) into the flat padded image."""

    def kernel(a_ref, w_ref, o_ref, relu_ref):
        # Single ReLU over the raw (padded) activations -- no 9x redundancy.
        relu_ref[...] = jnp.maximum(a_ref[...], 0.0)
        acc = jnp.zeros(o_ref.shape, jnp.float32)
        for k, off in enumerate(offsets):
            # Shifted 3x3 tap == contiguous row window of the flat padded image.
            a_k = relu_ref[off:off + m_out, :]              # [m_out, Cin]
            acc = acc + jnp.dot(a_k, w_ref[k],              # [Cin, Cout_pad]
                                preferred_element_type=jnp.float32)
        o_ref[...] = acc                                     # lane-dense 128-wide store

    return kernel


def relu_conv2d(x_nchw, w_oihw):
    """ReLU(x) -> Conv2d(Cin->Cout, 3x3, stride=1, padding=1, no bias), NCHW in/out."""
    N, C, H, W = x_nchw.shape
    Cout, Cin, KH, KW = w_oihw.shape
    assert Cin == C and KH == 3 and KW == 3

    Hp, Wp = H + 2, W + 2
    Lf = Hp * Wp                               # flattened padded image length
    LANE = 128
    Co_pad = _round_up(Cout, LANE)             # pad Cout so stores are lane-dense

    # Row offsets of the 9 taps inside the flattened padded image.
    # Output pixel (n,h,w) lives at flat row n*Lf + h*Wp + w and reads rows
    # (n*Lf + h*Wp + w) + kh*Wp + kw  -- no wraparound for valid (h,w).
    offsets = tuple(kh * Wp + kw for kh in range(KH) for kw in range(KW))
    max_off = max(offsets)

    M_out = _round_up(N * Lf, 8)               # rows the kernel produces
    A_rows = _round_up(M_out + max_off, 8)     # rows the kernel may read

    # ---- light wrapper-side layout prep (tiny fused copies; no im2col slab) ----
    x_nhwc = jnp.transpose(x_nchw, (0, 2, 3, 1))                      # [N,H,W,C]
    x_pad = jnp.pad(x_nhwc, ((0, 0), (1, 1), (1, 1), (0, 0)))         # [N,Hp,Wp,C]
    a_flat = x_pad.reshape(N * Lf, C).astype(jnp.float32)
    a_flat = jnp.pad(a_flat, ((0, A_rows - N * Lf), (0, 0)))          # [A_rows,C]

    # weights: (Cout,Cin,KH,KW) -> (KH*KW, Cin, Cout_pad), tap index k = kh*KW+kw
    w9 = jnp.transpose(w_oihw, (2, 3, 1, 0)).reshape(KH * KW, Cin, Cout)
    w9 = jnp.pad(w9, ((0, 0), (0, 0), (0, Co_pad - Cout))).astype(jnp.float32)

    kernel = _make_kernel(offsets, M_out)

    out = pl.pallas_call(
        kernel,
        out_shape=jax.ShapeDtypeStruct((M_out, Co_pad), jnp.float32),
        grid=(1,),
        in_specs=[
            pl.BlockSpec((A_rows, C), lambda i: (0, 0)),
            pl.BlockSpec((KH * KW, Cin, Co_pad), lambda i: (0, 0, 0)),
        ],
        out_specs=pl.BlockSpec((M_out, Co_pad), lambda i: (0, 0)),
        scratch_shapes=[pltpu.VMEM((A_rows, C), jnp.float32)],
    )(a_flat, w9)

    # Valid outputs live at flat row n*Lf + h*Wp + w; slice and return NCHW
    # (module semantics require NCHW; this is one tiny fused slice+transpose).
    y = out[: N * Lf].reshape(N, Hp, Wp, Co_pad)[:, :H, :W, :Cout]
    return jnp.transpose(y, (0, 3, 1, 2))


def _reference(x_nchw, w_oihw):
    # Pure-JAX reference (XLA conv) for a correctness check.
    y = jnp.maximum(x_nchw, 0.0)
    return jax.lax.conv_general_dilated(
        y, w_oihw, window_strides=(1, 1), padding=((1, 1), (1, 1)),
        dimension_numbers=("NCHW", "OIHW", "NCHW"),
    )


if __name__ == "__main__":
    key = jax.random.PRNGKey(0)
    kx, kw = jax.random.split(key)

    # Shapes implied by the module: x [1, 128, 7, 7], weight [32, 128, 3, 3]
    x = jax.random.normal(kx, (1, 128, 7, 7), dtype=jnp.float32)
    w = jax.random.normal(kw, (32, 128, 3, 3), dtype=jnp.float32) * 0.05

    out = relu_conv2d(x, w)
    out = jax.block_until_ready(out)

    ref = _reference(x, w)
    assert out.shape == (1, 32, 7, 7)
    assert jnp.allclose(out, ref, atol=1e-4, rtol=1e-4)

    print("KERNEL_OK")
</pallas_src>

<mosaic_0001>
module attributes {stable_mosaic.version = 11 : i64} {
  func.func @kernel(%arg0: i32, %arg1: memref<112x128xf32, #tpu.memory_space<vmem>>, %arg2: memref<9x128x128xf32, #tpu.memory_space<vmem>>, %arg3: memref<88x128xf32, #tpu.memory_space<vmem>>, %arg4: memref<112x128xf32, #tpu.memory_space<vmem>>) attributes {dimension_semantics = [#tpu.dimension_semantics<arbitrary>], iteration_bounds = array<i64: 1>, scalar_prefetch = 0 : i64, scratch_operands = 1 : i64, tpu.core_type = #tpu.core_type<tc>, window_params = [{pipeline_mode = #tpu.pipeline_mode<synchronous>, transform_indices = @transform_0, window_bounds = array<i64: 112, 128>}, {pipeline_mode = #tpu.pipeline_mode<synchronous>, transform_indices = @transform_1, window_bounds = array<i64: 9, 128, 128>}, {pipeline_mode = #tpu.pipeline_mode<synchronous>, transform_indices = @transform_2, window_bounds = array<i64: 88, 128>}]} {
    %c0 = arith.constant 0 : index
    %c0_0 = arith.constant 0 : index
    %0 = vector.load %arg1[%c0, %c0_0] : memref<112x128xf32, #tpu.memory_space<vmem>>, vector<112x128xf32>
    %cst = arith.constant 0.000000e+00 : f32
    %1 = vector.broadcast %cst : f32 to vector<112x128xf32>
    %2 = arith.maximumf %0, %1 : vector<112x128xf32>
    %c0_1 = arith.constant 0 : index
    %c0_2 = arith.constant 0 : index
    %3 = vector.load %arg4[%c0_1, %c0_2] : memref<112x128xf32, #tpu.memory_space<vmem>>, vector<112x128xf32>
    tpu.vector_store %arg4[%c0_1, %c0_2], %2 {strides = array<i32>} : memref<112x128xf32, #tpu.memory_space<vmem>>, vector<112x128xf32>,
    %cst_3 = arith.constant 0.000000e+00 : f32
    %4 = vector.broadcast %cst_3 : f32 to vector<88x128xf32>
    %c0_4 = arith.constant 0 : index
    %c0_5 = arith.constant 0 : index
    %5 = vector.load %arg4[%c0_4, %c0_5] : memref<112x128xf32, #tpu.memory_space<vmem>>, vector<88x128xf32>
    %c0_6 = arith.constant 0 : index
    %c0_7 = arith.constant 0 : index
    %c0_8 = arith.constant 0 : index
    %6 = vector.load %arg2[%c0_6, %c0_7, %c0_8] : memref<9x128x128xf32, #tpu.memory_space<vmem>>, vector<1x128x128xf32>
    %7 = vector.shape_cast %6 : vector<1x128x128xf32> to vector<128x128xf32>
    %cst_9 = arith.constant dense<0.000000e+00> : vector<88x128xf32>
    %8 = tpu.matmul %5, %7, %cst_9 {dimension_numbers = #tpu.dot_dimension_numbers<[1], [0], [0], [1], [0, 0, 1, 1], [], []>} : vector<88x128xf32>, vector<128x128xf32>, vector<88x128xf32> -> vector<88x128xf32>
    %9 = arith.addf %4, %8 : vector<88x128xf32>
    %c1 = arith.constant 1 : index
    %c0_10 = arith.constant 0 : index
    %10 = vector.load %arg4[%c1, %c0_10] : memref<112x128xf32, #tpu.memory_space<vmem>>, vector<88x128xf32>
    %c1_11 = arith.constant 1 : index
    %c0_12 = arith.constant 0 : index
    %c0_13 = arith.constant 0 : index
    %11 = vector.load %arg2[%c1_11, %c0_12, %c0_13] : memref<9x128x128xf32, #tpu.memory_space<vmem>>, vector<1x128x128xf32>
    %12 = vector.shape_cast %11 : vector<1x128x128xf32> to vector<128x128xf32>
    %cst_14 = arith.constant dense<0.000000e+00> : vector<88x128xf32>
    %13 = tpu.matmul %10, %12, %cst_14 {dimension_numbers = #tpu.dot_dimension_numbers<[1], [0], [0], [1], [0, 0, 1, 1], [], []>} : vector<88x128xf32>, vector<128x128xf32>, vector<88x128xf32> -> vector<88x128xf32>
    %14 = arith.addf %9, %13 : vector<88x128xf32>
    %c2 = arith.constant 2 : index
    %c0_15 = arith.constant 0 : index
    %15 = vector.load %arg4[%c2, %c0_15] : memref<112x128xf32, #tpu.memory_space<vmem>>, vector<88x128xf32>
    %c2_16 = arith.constant 2 : index
    %c0_17 = arith.constant 0 : index
    %c0_18 = arith.constant 0 : index
    %16 = vector.load %arg2[%c2_16, %c0_17, %c0_18] : memref<9x128x128xf32, #tpu.memory_space<vmem>>, vector<1x128x128xf32>
    %17 = vector.shape_cast %16 : vector<1x128x128xf32> to vector<128x128xf32>
    %cst_19 = arith.constant dense<0.000000e+00> : vector<88x128xf32>
    %18 = tpu.matmul %15, %17, %cst_19 {dimension_numbers = #tpu.dot_dimension_numbers<[1], [0], [0], [1], [0, 0, 1, 1], [], []>} : vector<88x128xf32>, vector<128x128xf32>, vector<88x128xf32> -> vector<88x128xf32>
    %19 = arith.addf %14, %18 : vector<88x128xf32>
    %c9 = arith.constant 9 : index
    %c0_20 = arith.constant 0 : index
    %20 = vector.load %arg4[%c9, %c0_20] : memref<112x128xf32, #tpu.memory_space<vmem>>, vector<88x128xf32>
    %c3 = arith.constant 3 : index
    %c0_21 = arith.constant 0 : index
    %c0_22 = arith.constant 0 : index
    %21 = vector.load %arg2[%c3, %c0_21, %c0_22] : memref<9x128x128xf32, #tpu.memory_space<vmem>>, vector<1x128x128xf32>
    %22 = vector.shape_cast %21 : vector<1x128x128xf32> to vector<128x128xf32>
    %cst_23 = arith.constant dense<0.000000e+00> : vector<88x128xf32>
    %23 = tpu.matmul %20, %22, %cst_23 {dimension_numbers = #tpu.dot_dimension_numbers<[1], [0], [0], [1], [0, 0, 1, 1], [], []>} : vector<88x128xf32>, vector<128x128xf32>, vector<88x128xf32> -> vector<88x128xf32>
    %24 = arith.addf %19, %23 : vector<88x128xf32>
    %c10 = arith.constant 10 : index
    %c0_24 = arith.constant 0 : index
    %25 = vector.load %arg4[%c10, %c0_24] : memref<112x128xf32, #tpu.memory_space<vmem>>, vector<88x128xf32>
    %c4 = arith.constant 4 : index
    %c0_25 = arith.constant 0 : index
    %c0_26 = arith.constant 0 : index
    %26 = vector.load %arg2[%c4, %c0_25, %c0_26] : memref<9x128x128xf32, #tpu.memory_space<vmem>>, vector<1x128x128xf32>
    %27 = vector.shape_cast %26 : vector<1x128x128xf32> to vector<128x128xf32>
    %cst_27 = arith.constant dense<0.000000e+00> : vector<88x128xf32>
    %28 = tpu.matmul %25, %27, %cst_27 {dimension_numbers = #tpu.dot_dimension_numbers<[1], [0], [0], [1], [0, 0, 1, 1], [], []>} : vector<88x128xf32>, vector<128x128xf32>, vector<88x128xf32> -> vector<88x128xf32>
    %29 = arith.addf %24, %28 : vector<88x128xf32>
    %c11 = arith.constant 11 : index
    %c0_28 = arith.constant 0 : index
    %30 = vector.load %arg4[%c11, %c0_28] : memref<112x128xf32, #tpu.memory_space<vmem>>, vector<88x128xf32>
    %c5 = arith.constant 5 : index
    %c0_29 = arith.constant 0 : index
    %c0_30 = arith.constant 0 : index
    %31 = vector.load %arg2[%c5, %c0_29, %c0_30] : memref<9x128x128xf32, #tpu.memory_space<vmem>>, vector<1x128x128xf32>
    %32 = vector.shape_cast %31 : vector<1x128x128xf32> to vector<128x128xf32>
    %cst_31 = arith.constant dense<0.000000e+00> : vector<88x128xf32>
    %33 = tpu.matmul %30, %32, %cst_31 {dimension_numbers = #tpu.dot_dimension_numbers<[1], [0], [0], [1], [0, 0, 1, 1], [], []>} : vector<88x128xf32>, vector<128x128xf32>, vector<88x128xf32> -> vector<88x128xf32>
    %34 = arith.addf %29, %33 : vector<88x128xf32>
    %c18 = arith.constant 18 : index
    %c0_32 = arith.constant 0 : index
    %35 = vector.load %arg4[%c18, %c0_32] : memref<112x128xf32, #tpu.memory_space<vmem>>, vector<88x128xf32>
    %c6 = arith.constant 6 : index
    %c0_33 = arith.constant 0 : index
    %c0_34 = arith.constant 0 : index
    %36 = vector.load %arg2[%c6, %c0_33, %c0_34] : memref<9x128x128xf32, #tpu.memory_space<vmem>>, vector<1x128x128xf32>
    %37 = vector.shape_cast %36 : vector<1x128x128xf32> to vector<128x128xf32>
    %cst_35 = arith.constant dense<0.000000e+00> : vector<88x128xf32>
    %38 = tpu.matmul %35, %37, %cst_35 {dimension_numbers = #tpu.dot_dimension_numbers<[1], [0], [0], [1], [0, 0, 1, 1], [], []>} : vector<88x128xf32>, vector<128x128xf32>, vector<88x128xf32> -> vector<88x128xf32>
    %39 = arith.addf %34, %38 : vector<88x128xf32>
    %c19 = arith.constant 19 : index
    %c0_36 = arith.constant 0 : index
    %40 = vector.load %arg4[%c19, %c0_36] : memref<112x128xf32, #tpu.memory_space<vmem>>, vector<88x128xf32>
    %c7 = arith.constant 7 : index
    %c0_37 = arith.constant 0 : index
    %c0_38 = arith.constant 0 : index
    %41 = vector.load %arg2[%c7, %c0_37, %c0_38] : memref<9x128x128xf32, #tpu.memory_space<vmem>>, vector<1x128x128xf32>
    %42 = vector.shape_cast %41 : vector<1x128x128xf32> to vector<128x128xf32>
    %cst_39 = arith.constant dense<0.000000e+00> : vector<88x128xf32>
    %43 = tpu.matmul %40, %42, %cst_39 {dimension_numbers = #tpu.dot_dimension_numbers<[1], [0], [0], [1], [0, 0, 1, 1], [], []>} : vector<88x128xf32>, vector<128x128xf32>, vector<88x128xf32> -> vector<88x128xf32>
    %44 = arith.addf %39, %43 : vector<88x128xf32>
    %c20 = arith.constant 20 : index
    %c0_40 = arith.constant 0 : index
    %45 = vector.load %arg4[%c20, %c0_40] : memref<112x128xf32, #tpu.memory_space<vmem>>, vector<88x128xf32>
    %c8 = arith.constant 8 : index
    %c0_41 = arith.constant 0 : index
    %c0_42 = arith.constant 0 : index
    %46 = vector.load %arg2[%c8, %c0_41, %c0_42] : memref<9x128x128xf32, #tpu.memory_space<vmem>>, vector<1x128x128xf32>
    %47 = vector.shape_cast %46 : vector<1x128x128xf32> to vector<128x128xf32>
    %cst_43 = arith.constant dense<0.000000e+00> : vector<88x128xf32>
    %48 = tpu.matmul %45, %47, %cst_43 {dimension_numbers = #tpu.dot_dimension_numbers<[1], [0], [0], [1], [0, 0, 1, 1], [], []>} : vector<88x128xf32>, vector<128x128xf32>, vector<88x128xf32> -> vector<88x128xf32>
    %49 = arith.addf %44, %48 : vector<88x128xf32>
    %c0_44 = arith.constant 0 : index
    %c0_45 = arith.constant 0 : index
    %50 = vector.load %arg3[%c0_44, %c0_45] : memref<88x128xf32, #tpu.memory_space<vmem>>, vector<88x128xf32>
    tpu.vector_store %arg3[%c0_44, %c0_45], %49 {strides = array<i32>} : memref<88x128xf32, #tpu.memory_space<vmem>>, vector<88x128xf32>,
    return
  }
  func.func @transform_0(%arg0: i32) -> (i32, i32) {
    %c0_i32 = arith.constant 0 : i32
    %c0_i32_0 = arith.constant 0 : i32
    %c0_i32_1 = arith.constant 0 : i32
    return %c0_i32, %c0_i32_0 : i32, i32
  }
  func.func @transform_1(%arg0: i32) -> (i32, i32, i32) {
    %c0_i32 = arith.constant 0 : i32
    %c0_i32_0 = arith.constant 0 : i32
    %c0_i32_1 = arith.constant 0 : i32
    %c0_i32_2 = arith.constant 0 : i32
    return %c0_i32, %c0_i32_0, %c0_i32_1 : i32, i32, i32
  }
  func.func @transform_2(%arg0: i32) -> (i32, i32) {
    %c0_i32 = arith.constant 0 : i32
    %c0_i32_0 = arith.constant 0 : i32
    %c0_i32_1 = arith.constant 0 : i32
    return %c0_i32, %c0_i32_0 : i32, i32
  }
}

</mosaic_0001>

<bundles_post_ra>
// kernel: tpu_custom_call.1
= control target key start
LH: loop header
LB: loop body
LE: loop exit
PB: predicated region body
PF: predicated region fallthrough
CT: control target
= control target key end

     0   :  { %7 = vsyncpa [#allocation4], 0  ;;  %s1312_s0 = inlined_call_operand.hbm [shape: f32[112,128], index: 0, kind: input, shape index: {}]   ;;  %s1313_s1 = inlined_call_operand.hbm [shape: f32[9,128,128], index: 1, kind: input, shape index: {}]   ;;  %s1314_s2 = inlined_call_operand.hbm [shape: f32[88,128], index: 2, kind: output, shape index: {}]  }
   0x1   :  { %8 = vsyncpa [#allocation7], 0 }
   0x2   :  { %9 = vsyncpa [#allocation5], 0  ;;  %s14_s11 = sshll.u32 %s1312_s0, 4  ;;  %s1026_s12 = smov [#allocation3]   ;;  %s15_s11 = int_to_ptr.hbm [resolvable:$true] %s14_s11 }
   0x3   :  { %s16_s13 = sshll.u32 %s1026_s12, 4  ;;  %s27_s16 = sshll.u32 %s1313_s1, 4  ;;  %s17_s13 = int_to_ptr.vmem [resolvable:$true] %s16_s13  ;;  %s28_s16 = int_to_ptr.hbm [resolvable:$true] %s27_s16 }
   0x4   :  { %s1027_s17 = smov 128   ;;  %s1028_s18 = smov 8  }
   0x5   :  { %22 = dma.hbm_to_vmem [thread:$0]  %s15_s11, 1792, %s17_s13, [#allocation4], %s1027_s17, %s1027_s17, %s1028_s18  }
   0x6   :  { %s1029_s19 = smov [#allocation6]  }
   0x7   :  { %s29_s20 = sshll.u32 %s1029_s19, 4  ;;  %s30_s20 = int_to_ptr.vmem [resolvable:$true] %s29_s20 }
   0x8   :  { %35 = dma.hbm_to_vmem [thread:$0]  %s28_s16, 18432, %s30_s20, [#allocation7], %s1027_s17, %s1027_s17, %s1028_s18  }
   0x9   :  { %1020 = dma.done.wait [#allocation4], 1792  }
   0xa   :  { %1021 = vsyncadd [#allocation4], 4294965504 }
   0xb   :  { %1022 = dma.done.wait [#allocation7], 18432  }
   0xc   :  { %1023 = vsyncadd [#allocation7], 4294948864  ;;  %v140_v0 = vld [vmem:[#allocation6 + $0xf8] sm:$0xff]  ;;  %v139_v1 = vld [vmem:[#allocation6 + $0xf0] sm:$0xff]  ;;  %s1030_s0 = smov [#allocation8]   ;;  %s881_s23 = sshll.u32 %s1314_s2, 4  ;;  %s882_s23 = int_to_ptr.hbm [resolvable:$true] %s881_s23 }
   0xd   :  { %895 = vmatpush.msra.mxu1 %v140_v0  ;;  %896 = vmatpush.msra.mxu2 %v140_v0  ;;  %v138_v2 = vld [vmem:[#allocation6 + $0xe8] sm:$0xff]  ;;  %v137_v3 = vld [vmem:[#allocation6 + $0xe0] sm:$0xff]  ;;  %v357_v4 = vld [vmem:[#allocation6 + $0x1f8] sm:$0xff]  ;;  %s879_s1 = sshll.u32 %s1030_s0, 4  ;;  %s880_s1 = int_to_ptr.vmem [resolvable:$true] %s879_s1 }
   0xe   :  { %141 = vmatpush.msra.mxu0 %v140_v0  ;;  %v356_v5 = vld [vmem:[#allocation6 + $0x1f0] sm:$0xff]  ;;  %v136_v6 = vld [vmem:[#allocation6 + $0xd8] sm:$0xff]  ;;  %358 = vmatpush.msra.mxu3 %v357_v4  ;;  %v355_v11 = vld [vmem:[#allocation6 + $0x1e8] sm:$0xff] }
   0xf   :  { %897 = vmatpush.msra.mxu1 %v139_v1  ;;  %898 = vmatpush.msra.mxu2 %v139_v1  ;;  %v1058_v7 = vld [vmem:[#allocation3 + $0x20] sm:$0xff]  ;;  %v1060_v8 = vld [vmem:[#allocation3 + $0x28] sm:$0xff]  ;;  %v354_v13 = vld [vmem:[#allocation6 + $0x1e0] sm:$0xff] }
  0x10   :  { %142 = vmatpush.msra.mxu0 %v139_v1  ;;  %v62_v9 = vmax.f32 %v1058_v7, 0.0  ;;  %v63_v10 = vmax.f32 %v1060_v8, 0.0  ;;  %v135_v12 = vld [vmem:[#allocation6 + $0xd0] sm:$0xff]  ;;  %359 = vmatpush.msra.mxu3 %v356_v5  ;;  %v134_v14 = vld [vmem:[#allocation6 + $0xc8] sm:$0xff]  ;;  %v1070_v16 = vld [vmem:[#allocation3 + $0x48] sm:$0xff] }
  0x11   :  { %899 = vmatpush.msra.mxu1 %v138_v2  ;;  %900 = vmatpush.msra.mxu2 %v138_v2  ;;  %v1068_v15 = vld [vmem:[#allocation3 + $0x40] sm:$0xff]  ;;  %v353_v17 = vld [vmem:[#allocation6 + $0x1d8] sm:$0xff]  ;;  %v67_v19 = vmax.f32 %v1070_v16, 0.0  ;;  %v1074_v20 = vld [vmem:[#allocation3 + $0x30] sm:$0xff] }
  0x12   :  { %143 = vmatpush.msra.mxu0 %v138_v2  ;;  %76 = vst [vmem:[#allocation2 + $0x20] sm:$0xff] %v62_v9  ;;  %360 = vmatpush.msra.mxu3 %v355_v11  ;;  %v66_v18 = vmax.f32 %v1068_v15, 0.0  ;;  %v133_v21 = vld [vmem:[#allocation6 + $0xc0] sm:$0xff]  ;;  %v64_v22 = vmax.f32 %v1074_v20, 0.0  ;;  %v1077_v23 = vld [vmem:[#allocation3] sm:$0xff]  ;;  %v1079_v24 = vld [vmem:[#allocation3 + $0x8] sm:$0xff] }
  0x13   :  { %901 = vmatpush.msra.mxu1 %v137_v3  ;;  %902 = vmatpush.msra.mxu2 %v137_v3  ;;  %77 = vst [vmem:[#allocation2 + $0x28] sm:$0xff] %v63_v10  ;;  %v352_v25 = vld [vmem:[#allocation6 + $0x1d0] sm:$0xff]  ;;  %v58_v26 = vmax.f32 %v1077_v23, 0.0  ;;  %v59_v27 = vmax.f32 %v1079_v24, 0.0  ;;  %v132_v28 = vld [vmem:[#allocation6 + $0xb8] sm:$0xff]  ;;  %v351_v29 = vld [vmem:[#allocation6 + $0x1c8] sm:$0xff] }
  0x14   :  { %144 = vmatpush.msra.mxu0 %v137_v3  ;;  %361 = vmatpush.msra.mxu3 %v354_v13  ;;  %80 = vst [vmem:[#allocation2 + $0x40] sm:$0xff] %v66_v18  ;;  %v131_v30 = vld [vmem:[#allocation6 + $0xb0] sm:$0xff]  ;;  %v350_v31 = vld [vmem:[#allocation6 + $0x1c0] sm:$0xff]  ;;  %v130_v33 = vld [vmem:[#allocation6 + $0xa8] sm:$0xff] }
  0x15   :  { %903 = vmatpush.msra.mxu1 %v136_v6  ;;  %904 = vmatpush.msra.mxu2 %v136_v6  ;;  %81 = vst [vmem:[#allocation2 + $0x48] sm:$0xff] %v67_v19  ;;  %v1093_v32 = vld [vmem:[#allocation3 + $0x50] sm:$0xff]  ;;  %v1096_v35 = vld [vmem:[#allocation3 + $0x38] sm:$0xff]  ;;  %v349_v36 = vld [vmem:[#allocation6 + $0x1b8] sm:$0xff] }
  0x16   :  { %145 = vmatpush.msra.mxu0 %v136_v6  ;;  %362 = vmatpush.msra.mxu3 %v353_v17  ;;  %78 = vst [vmem:[#allocation2 + $0x30] sm:$0xff] %v64_v22  ;;  %v68_v34 = vmax.f32 %v1093_v32, 0.0  ;;  %v65_v37 = vmax.f32 %v1096_v35, 0.0  ;;  %v1099_v38 = vld [vmem:[#allocation3 + $0x10] sm:$0xff]  ;;  %v348_v41 = vld [vmem:[#allocation6 + $0x1b0] sm:$0xff]  ;;  %v128_v42 = vld [vmem:[#allocation6 + $0x98] sm:$0xff] }
  0x17   :  { %905 = vmatpush.msra.mxu1 %v135_v12  ;;  %906 = vmatpush.msra.mxu2 %v135_v12  ;;  %72 = vst [vmem:[#allocation2] sm:$0xff] %v58_v26  ;;  %v129_v39 = vld [vmem:[#allocation6 + $0xa0] sm:$0xff]  ;;  %v60_v40 = vmax.f32 %v1099_v38, 0.0  ;;  %v347_v43 = vld [vmem:[#allocation6 + $0x1a8] sm:$0xff]  ;;  %v127_v44 = vld [vmem:[#allocation6 + $0x90] sm:$0xff] }
  0x18   :  { %146 = vmatpush.msra.mxu0 %v135_v12  ;;  %363 = vmatpush.msra.mxu3 %v352_v25  ;;  %73 = vst [vmem:[#allocation2 + $0x8] sm:$0xff] %v59_v27  ;;  %v55_v45 = vld [vmem:[#allocation3 + $0x58] sm:$0xff]  ;;  %v346_v46 = vld [vmem:[#allocation6 + $0x1a0] sm:$0xff]  ;;  %v345_v50 = vld [vmem:[#allocation6 + $0x198] sm:$0xff] }
  0x19   :  { %907 = vmatpush.msra.mxu1 %v134_v14  ;;  %908 = vmatpush.msra.mxu2 %v134_v14  ;;  %82 = vst [vmem:[#allocation2 + $0x50] sm:$0xff] %v68_v34  ;;  %v69_v47 = vmax.f32 %v55_v45, 0.0  ;;  %v126_v48 = vld [vmem:[#allocation6 + $0x88] sm:$0xff]  ;;  %v125_v52 = vld [vmem:[#allocation6 + $0x80] sm:$0xff]  ;;  %v268_v54 = vld [vmem:[#allocation6 + $0x178] sm:$0xff] }
  0x1a   :  { %147 = vmatpush.msra.mxu0 %v134_v14  ;;  %364 = vmatpush.msra.mxu3 %v351_v29  ;;  %79 = vst [vmem:[#allocation2 + $0x38] sm:$0xff] %v65_v37  ;;  %v1108_v49 = vld [vmem:[#allocation3 + $0x18] sm:$0xff]  ;;  %v112_v55 = vld [vmem:[#allocation6 + $0x78] sm:$0xff]  ;;  %v267_v57 = vld [vmem:[#allocation6 + $0x170] sm:$0xff] }
  0x1b   :  { %909 = vmatpush.msra.mxu1 %v133_v21  ;;  %910 = vmatpush.msra.mxu2 %v133_v21  ;;  %74 = vst [vmem:[#allocation2 + $0x10] sm:$0xff] %v60_v40  ;;  %v61_v51 = vmax.f32 %v1108_v49, 0.0  ;;  %v1111_v53 = vld [vmem:[#allocation2 + $0x21] sm:$0xff]  ;;  %v111_v58 = vld [vmem:[#allocation6 + $0x70] sm:$0xff]  ;;  %v446_v61 = vld [vmem:[#allocation6 + $0x278] sm:$0xff] }
  0x1c   :  { %148 = vmatpush.msra.mxu0 %v133_v21  ;;  %365 = vmatpush.msra.mxu3 %v350_v31  ;;  %83 = vst [vmem:[#allocation2 + $0x58] sm:$0xff] %v69_v47  ;;  %v1115_v56 = vld [vmem:[#allocation2 + $0x41] sm:$0xff]  ;;  %v344_v63 = vld [vmem:[#allocation6 + $0x190] sm:$0xff]  ;;  %v264_v5 = vld [vmem:[#allocation6 + $0x158] sm:$0xff] }
  0x1d   :  { %911 = vmatpush.msra.mxu1 %v132_v28  ;;  %912 = vmatpush.msra.mxu2 %v132_v28  ;;  %75 = vst [vmem:[#allocation2 + $0x18] sm:$0xff] %v61_v51  ;;  %v266_v60 = vld [vmem:[#allocation6 + $0x168] sm:$0xff]  ;;  %v265_v0 = vld [vmem:[#allocation6 + $0x160] sm:$0xff]  ;;  %v445_v1 = vld [vmem:[#allocation6 + $0x270] sm:$0xff] }
  0x1e   :  { %149 = vmatpush.msra.mxu0 %v132_v28  ;;  %366 = vmatpush.msra.mxu3 %v349_v36  ;;  %v110_v62 = vld [vmem:[#allocation6 + $0x68] sm:$0xff]  ;;  %v109_v2 = vld [vmem:[#allocation6 + $0x60] sm:$0xff]  ;;  %v108_v6 = vld [vmem:[#allocation6 + $0x58] sm:$0xff] }
  0x1f   :  { %913 = vmatpush.msra.mxu1 %v131_v30  ;;  %914 = vmatpush.msra.mxu2 %v131_v30  ;;  %v113_v59 = vld [vmem:[#allocation2 + $0x1] sm:$0xff]  ;;  %v1119_v4 = vld [vmem:[#allocation2 + $0x29] sm:$0xff]  ;;  %v442_v31 = vld [vmem:[#allocation6 + $0x258] sm:$0xff] }
  0x20   :  { %150 = vmatpush.msra.mxu0 %v131_v30  ;;  %367 = vmatpush.msra.mxu3 %v348_v41  ;;  %v343_v3 = vld [vmem:[#allocation6 + $0x188] sm:$0xff]  ;;  %v263_v12 = vld [vmem:[#allocation6 + $0x150] sm:$0xff]  ;;  %v342_v13 = vld [vmem:[#allocation6 + $0x180] sm:$0xff] }
  0x21   :  { %915 = vmatpush.msra.mxu1 %v130_v33  ;;  %916 = vmatpush.msra.mxu2 %v130_v33  ;;  %v444_v11 = vld [vmem:[#allocation6 + $0x268] sm:$0xff]  ;;  %v107_v14 = vld [vmem:[#allocation6 + $0x50] sm:$0xff]  ;;  %v443_v25 = vld [vmem:[#allocation6 + $0x260] sm:$0xff] }
  0x22   :  { %151 = vmatpush.msra.mxu0 %v130_v33  ;;  %368 = vmatpush.msra.mxu3 %v347_v43  ;;  %v1122_v17 = vld [vmem:[#allocation2 + $0x49] sm:$0xff]  ;;  %v261_v30 = vld [vmem:[#allocation6 + $0x140] sm:$0xff]  ;;  %v1125_v36 = vld [vmem:[#allocation2 + $0x31] sm:$0xff] }
  0x23   :  { %917 = vmatpush.msra.mxu1 %v129_v39  ;;  %918 = vmatpush.msra.mxu2 %v129_v39  ;;  %v262_v21 = vld [vmem:[#allocation6 + $0x148] sm:$0xff]  ;;  %v105_v33 = vld [vmem:[#allocation6 + $0x40] sm:$0xff]  ;;  %v104_v41 = vld [vmem:[#allocation6 + $0x38] sm:$0xff] }
  0x24   :  { %152 = vmatpush.msra.mxu0 %v129_v39  ;;  %369 = vmatpush.msra.mxu3 %v346_v46  ;;  %v106_v28 = vld [vmem:[#allocation6 + $0x48] sm:$0xff]  ;;  %v260_v39 = vld [vmem:[#allocation6 + $0x138] sm:$0xff]  ;;  %v259_v43 = vld [vmem:[#allocation6 + $0x130] sm:$0xff] }
  0x25   :  { %919 = vmatpush.msra.mxu1 %v128_v42  ;;  %920 = vmatpush.msra.mxu2 %v128_v42  ;;  %v114_v29 = vld [vmem:[#allocation2 + $0x9] sm:$0xff]  ;;  %v620_v23 = vld [vmem:[#allocation6 + $0x358] sm:$0xff]  ;;  %v787_v35 = vld [vmem:[#allocation6 + $0x400] sm:$0xff] }
  0x26   :  { %153 = vmatpush.msra.mxu0 %v128_v42  ;;  %370 = vmatpush.msra.mxu3 %v345_v50  ;;  %v441_v42 = vld [vmem:[#allocation6 + $0x250] sm:$0xff]  ;;  %v440_v46 = vld [vmem:[#allocation6 + $0x248] sm:$0xff]  ;;  %v527_v38 = vld [vmem:[#allocation6 + $0x2b8] sm:$0xff] }
  0x27   :  { %921 = vmatpush.msra.mxu1 %v127_v44  ;;  %922 = vmatpush.msra.mxu2 %v127_v44  ;;  %v103_v45 = vld [vmem:[#allocation6 + $0x30] sm:$0xff]  ;;  %v258_v47 = vld [vmem:[#allocation6 + $0x128] sm:$0xff] }
  0x28   :  { %154 = vmatpush.msra.mxu0 %v127_v44  ;;  %371 = vmatpush.msra.mxu3 %v344_v63  ;;  %v713_v44 = vld [vmem:[#allocation6 + $0x3f8] sm:$0xff]  ;;  %v102_v50 = vld [vmem:[#allocation6 + $0x28] sm:$0xff]  ;;  %v255_v63 = vld [vmem:[#allocation6 + $0x110] sm:$0xff] }
  0x29   :  { %923 = vmatpush.msra.mxu1 %v126_v48  ;;  %924 = vmatpush.msra.mxu2 %v126_v48  ;;  %v1146_v24 = vld [vmem:[#allocation6 + $0x468] sm:$0xff]  ;;  %v611_v7 = vld [vmem:[#allocation6 + $0x310] sm:$0xff] }
  0x2a   :  { %155 = vmatpush.msra.mxu0 %v126_v48  ;;  %372 = vmatpush.msra.mxu3 %v343_v3  ;;  %v712_v48 = vld [vmem:[#allocation6 + $0x3f0] sm:$0xff]  ;;  %v711_v3 = vld [vmem:[#allocation6 + $0x3e8] sm:$0xff] }
  0x2b   :  { %925 = vmatpush.msra.mxu1 %v125_v52  ;;  %926 = vmatpush.msra.mxu2 %v125_v52  ;;  %v1178_v49 = vld [vmem:[#allocation2 + $0x22] sm:$0xff]  ;;  %v789_v20 = vld [vmem:[#allocation6 + $0x410] sm:$0xff] }
  0x2c   :  { %169 = vmatmul.f32.vlgmr.msra.gmra.mxu1 %v1111_v53  ;;  %181 = vmatmul.f32.vlgmr.msra.gmra.mxu2 %v1115_v56  ;;  %v521_v8 = vld [vmem:[#allocation6 + $0x288] sm:$0xff]  ;;  %v686_v15 = vld [vmem:[#allocation2 + $0x13] sm:$0xff] }
  0x2d   :  { %269 = vmatpush.msrb.mxu2 %v268_v54  ;;  %191 = vmatpush.msrb.mxu1 %v112_v55  ;;  %v257_v54 = vld [vmem:[#allocation6 + $0x120] sm:$0xff]  ;;  %v508_v16 = vld [vmem:[#allocation2 + $0xb] sm:$0xff]  ;;  %v775_v32 = vld [vmem:[#allocation2 + $0x14] sm:$0xff] }
  0x2e   :  { %156 = vmatpush.msra.mxu0 %v125_v52  ;;  %373 = vmatpush.msra.mxu3 %v342_v13  ;;  %v1128_v52 = vld [vmem:[#allocation2 + $0x51] sm:$0xff]  ;;  %v439_v55 = vld [vmem:[#allocation6 + $0x240] sm:$0xff] }
  0x2f   :  { %270 = vmatpush.msrb.mxu2 %v267_v57  ;;  %192 = vmatpush.msrb.mxu1 %v111_v58  ;;  %v101_v57 = vld [vmem:[#allocation6 + $0x20] sm:$0xff]  ;;  %v115_v58 = vld [vmem:[#allocation2 + $0x11] sm:$0xff] }
  0x30   :  { %157 = vmatmul.f32.vlgmr.msra.gmra.mxu0 %v113_v59  ;;  %374 = vmatmul.f32.vlgmr.msra.gmra.mxu3 %v114_v29  ;;  %v1131_v59 = vld [vmem:[#allocation2 + $0x39] sm:$0xff] }
  0x31   :  { %271 = vmatpush.msrb.mxu2 %v266_v60  ;;  %447 = vmatpush.msrb.mxu0 %v446_v61  ;;  %v256_v60 = vld [vmem:[#allocation6 + $0x118] sm:$0xff]  ;;  %v97_v13 = vld [vmem:[#allocation6] sm:$0xff] }
  0x32   :  { %193 = vmatpush.msrb.mxu1 %v110_v62  ;;  %714 = vmatpush.msrb.mxu3 %v713_v44  ;;  %v100_v61 = vld [vmem:[#allocation6 + $0x18] sm:$0xff] }
  0x33   :  { %272 = vmatpush.msrb.mxu2 %v265_v0  ;;  %448 = vmatpush.msrb.mxu0 %v445_v1  ;;  %v438_v62 = vld [vmem:[#allocation6 + $0x238] sm:$0xff]  ;;  %v99_v0 = vld [vmem:[#allocation6 + $0x10] sm:$0xff] }
  0x34   :  { %194 = vmatpush.msrb.mxu1 %v109_v2  ;;  %184 = vmatmul.f32.gmra.mxu2 %v1122_v17  ;;  %v437_v1 = vld [vmem:[#allocation6 + $0x230] sm:$0xff]  ;;  %v254_v2 = vld [vmem:[#allocation6 + $0x108] sm:$0xff]  ;;  %v709_v44 = vld [vmem:[#allocation6 + $0x3d8] sm:$0xff] }
  0x35   :  { %172 = vmatmul.f32.gmra.mxu1 %v1119_v4  ;;  %273 = vmatpush.msrb.mxu2 %v264_v5  ;;  %v98_v5 = vld [vmem:[#allocation6 + $0x8] sm:$0xff] }
  0x36   :  { %195 = vmatpush.msrb.mxu1 %v108_v6  ;;  %449 = vmatpush.msrb.mxu0 %v444_v11  ;;  %v436_v6 = vld [vmem:[#allocation6 + $0x228] sm:$0xff]  ;;  %v253_v11 = vld [vmem:[#allocation6 + $0x100] sm:$0xff] }
  0x37   :  { %274 = vmatpush.msrb.mxu2 %v263_v12  ;;  %715 = vmatpush.msrb.mxu3 %v712_v48  ;;  %v710_v12 = vld [vmem:[#allocation6 + $0x3e0] sm:$0xff]  ;;  %v708_v48 = vld [vmem:[#allocation6 + $0x3d0] sm:$0xff] }
  0x38   :  { %196 = vmatpush.msrb.mxu1 %v107_v14  ;;  %450 = vmatpush.msrb.mxu0 %v443_v25  ;;  %v241_v14 = vld [vmem:[#allocation2 + $0x2] sm:$0xff] }
  0x39   :  { %275 = vmatpush.msrb.mxu2 %v262_v21  ;;  %160 = vmatmul.f32.gmra.mxu0 %v114_v29  ;;  %v624_v21 = vld [vmem:[#allocation6 + $0x378] sm:$0xff]  ;;  %v435_v25 = vld [vmem:[#allocation6 + $0x220] sm:$0xff] }
  0x3a   :  { %197 = vmatpush.msrb.mxu1 %v106_v28  ;;  %451 = vmatpush.msrb.mxu0 %v442_v31  ;;  %v535_v28 = vld [vmem:[#allocation6 + $0x2f8] sm:$0xff] }
  0x3b   :  { %276 = vmatpush.msrb.mxu2 %v261_v30  ;;  %377 = vmatmul.f32.gmra.mxu3 %v115_v58  ;;  %v116_v29 = vld [vmem:[#allocation2 + $0x19] sm:$0xff]  ;;  %v623_v30 = vld [vmem:[#allocation6 + $0x370] sm:$0xff] }
  0x3c   :  { %198 = vmatpush.msrb.mxu1 %v105_v33  ;;  %452 = vmatpush.msrb.mxu0 %v441_v42  ;;  %v434_v31 = vld [vmem:[#allocation6 + $0x218] sm:$0xff]  ;;  %v534_v33 = vld [vmem:[#allocation6 + $0x2f0] sm:$0xff]  ;;  %v533_v42 = vld [vmem:[#allocation6 + $0x2e8] sm:$0xff] }
  0x3d   :  { %175 = vmatmul.f32.gmra.mxu1 %v1125_v36  ;;  %277 = vmatpush.msrb.mxu2 %v260_v39  ;;  %v622_v39 = vld [vmem:[#allocation6 + $0x368] sm:$0xff] }
  0x3e   :  { %199 = vmatpush.msrb.mxu1 %v104_v41  ;;  %453 = vmatpush.msrb.mxu0 %v440_v46  ;;  %v433_v41 = vld [vmem:[#allocation6 + $0x210] sm:$0xff] }
  0x3f   :  { %278 = vmatpush.msrb.mxu2 %v259_v43  ;;  %716 = vmatpush.msrb.mxu3 %v711_v3  ;;  %v621_v43 = vld [vmem:[#allocation6 + $0x360] sm:$0xff]  ;;  %v242_v46 = vld [vmem:[#allocation2 + $0xa] sm:$0xff] }
  0x40   :  { %200 = vmatpush.msrb.mxu1 %v103_v45  ;;  %187 = vmatmul.f32.gmra.mxu2 %v1128_v52  ;;  %v432_v45 = vld [vmem:[#allocation6 + $0x208] sm:$0xff]  ;;  %v528_v3 = vld [vmem:[#allocation6 + $0x2c0] sm:$0xff] }
  0x41   :  { %279 = vmatpush.msrb.mxu2 %v258_v47  ;;  %454 = vmatpush.msrb.mxu0 %v439_v55  ;;  %v532_v47 = vld [vmem:[#allocation6 + $0x2e0] sm:$0xff]  ;;  %v619_v55 = vld [vmem:[#allocation6 + $0x350] sm:$0xff] }
  0x42   :  { %201 = vmatpush.msrb.mxu1 %v102_v50  ;;  %163 = vmatmul.f32.gmra.mxu0 %v115_v58  ;;  %v1138_v50 = vld [vmem:[#allocation6 + $0x478] sm:$0xff]  ;;  %v707_v58 = vld [vmem:[#allocation6 + $0x3c8] sm:$0xff] }
  0x43   :  { %280 = vmatpush.msrb.mxu2 %v257_v54  ;;  %455 = vmatpush.msrb.mxu0 %v438_v62  ;;  %v531_v54 = vld [vmem:[#allocation6 + $0x2d8] sm:$0xff] }
  0x44   :  { %202 = vmatpush.msrb.mxu1 %v101_v57  ;;  %717 = vmatpush.msrb.mxu3 %v710_v12  ;;  %v1140_v57 = vld [vmem:[#allocation6 + $0x470] sm:$0xff]  ;;  %v703_v12 = vld [vmem:[#allocation6 + $0x3a8] sm:$0xff] }
  0x45   :  { %178 = vmatmul.f32.gmra.mxu1 %v1131_v59  ;;  %281 = vmatpush.msrb.mxu2 %v256_v60  ;;  %v530_v60 = vld [vmem:[#allocation6 + $0x2d0] sm:$0xff] }
  0x46   :  { %203 = vmatpush.msrb.mxu1 %v100_v61  ;;  %456 = vmatpush.msrb.mxu0 %v437_v1  ;;  %v618_v61 = vld [vmem:[#allocation6 + $0x348] sm:$0xff]  ;;  %v1143_v62 = vld [vmem:[#allocation2 + $0x12] sm:$0xff]  ;;  %v617_v1 = vld [vmem:[#allocation6 + $0x340] sm:$0xff] }
  0x47   :  { %282 = vmatpush.msrb.mxu2 %v255_v63  ;;  %380 = vmatmul.f32.gmra.mxu3 %v116_v29  ;;  %v1149_v63 = vld [vmem:[#allocation6 + $0x460] sm:$0xff] }
  0x48   :  { %204 = vmatpush.msrb.mxu1 %v99_v0  ;;  %457 = vmatpush.msrb.mxu0 %v436_v6  ;;  %v529_v0 = vld [vmem:[#allocation6 + $0x2c8] sm:$0xff]  ;;  %v704_v6 = vld [vmem:[#allocation6 + $0x3b0] sm:$0xff] }
  0x49   :  { %283 = vmatpush.msrb.mxu2 %v254_v2  ;;  %718 = vmatpush.msrb.mxu3 %v709_v44  ;;  %v1155_v2 = vld [vmem:[#allocation6 + $0x458] sm:$0xff] }
  0x4a   :  { %205 = vmatpush.msrb.mxu1 %v98_v5  ;;  %458 = vmatpush.msrb.mxu0 %v435_v25  ;;  %v616_v5 = vld [vmem:[#allocation6 + $0x338] sm:$0xff]  ;;  %v614_v25 = vld [vmem:[#allocation6 + $0x328] sm:$0xff] }
  0x4b   :  { %284 = vmatpush.msrb.mxu2 %v253_v11  ;;  %166 = vmatmul.f32.gmra.mxu0 %v116_v29  ;;  %v1160_v11 = vld [vmem:[#allocation6 + $0x450] sm:$0xff]  ;;  %v525_v29 = vld [vmem:[#allocation6 + $0x2a8] sm:$0xff]  ;;  %v523_v44 = vld [vmem:[#allocation6 + $0x298] sm:$0xff] }
  0x4c   :  { %206 = vmatpush.msrb.mxu1 %v97_v13  ;;  %285 = vmatmul.f32.vlgmr.msrb.gmra.mxu2 %v241_v14  ;;  %v615_v13 = vld [vmem:[#allocation6 + $0x330] sm:$0xff]  ;;  %v1166_v14 = vld [vmem:[#allocation6 + $0x448] sm:$0xff] }
  0x4d   :  { %625 = vmatpush.msra.mxu2 %v624_v21  ;;  %207 = vmatmul.f32.vlgmr.msrb.gmra.mxu1 %v58_v26  ;;  %v431_v26 = vld [vmem:[#allocation6 + $0x200] sm:$0xff]  ;;  %v526_v21 = vld [vmem:[#allocation6 + $0x2b0] sm:$0xff] }
  0x4e   :  { %536 = vmatpush.msra.mxu1 %v535_v28  ;;  %459 = vmatpush.msrb.mxu0 %v434_v31  ;;  %v1171_v28 = vld [vmem:[#allocation6 + $0x440] sm:$0xff]  ;;  %v701_v31 = vld [vmem:[#allocation6 + $0x398] sm:$0xff] }
  0x4f   :  { %626 = vmatpush.msra.mxu2 %v623_v30  ;;  %719 = vmatpush.msrb.mxu3 %v708_v48  ;;  %v613_v30 = vld [vmem:[#allocation6 + $0x320] sm:$0xff]  ;;  %v1196_v48 = vld [vmem:[#allocation2 + $0x32] sm:$0xff] }
  0x50   :  { %537 = vmatpush.msra.mxu1 %v534_v33  ;;  %460 = vmatpush.msrb.mxu0 %v433_v41  ;;  %v1176_v33 = vld [vmem:[#allocation6 + $0x438] sm:$0xff] }
  0x51   :  { %627 = vmatpush.msra.mxu2 %v622_v39  ;;  %383 = vmatmul.f32.gmra.mxu3 %v1111_v53  ;;  %v705_v53 = vld [vmem:[#allocation6 + $0x3b8] sm:$0xff]  ;;  %v56_v39 = vld [vmem:[#allocation3 + $0x60] sm:$0xff] }
  0x52   :  { %538 = vmatpush.msra.mxu1 %v533_v42  ;;  %461 = vmatpush.msrb.mxu0 %v432_v45  ;;  %v612_v41 = vld [vmem:[#allocation6 + $0x318] sm:$0xff]  ;;  %v700_v42 = vld [vmem:[#allocation6 + $0x390] sm:$0xff] }
  0x53   :  { %628 = vmatpush.msra.mxu2 %v621_v43  ;;  %720 = vmatpush.msrb.mxu3 %v707_v58  ;;  %v1186_v43 = vld [vmem:[#allocation6 + $0x430] sm:$0xff] }
  0x54   :  { %288 = vmatmul.f32.gmra.mxu2 %v242_v46  ;;  %462 = vmatpush.msrb.mxu0 %v431_v26  ;;  %v1188_v45 = vld [vmem:[#allocation2 + $0x2a] sm:$0xff] }
  0x55   :  { %210 = vmatmul.f32.gmra.mxu1 %v59_v27  ;;  %629 = vmatpush.msra.mxu2 %v620_v23  ;;  %v706_v27 = vld [vmem:[#allocation6 + $0x3c0] sm:$0xff]  ;;  %v522_v23 = vld [vmem:[#allocation6 + $0x290] sm:$0xff]  ;;  %v610_v26 = vld [vmem:[#allocation6 + $0x308] sm:$0xff] }
  0x56   :  { %539 = vmatpush.msra.mxu1 %v532_v47  ;;  %463 = vmatmul.f32.vlgmr.msrb.gmra.mxu0 %v242_v46  ;;  %v792_v46 = vld [vmem:[#allocation6 + $0x428] sm:$0xff]  ;;  %v791_v47 = vld [vmem:[#allocation6 + $0x420] sm:$0xff] }
  0x57   :  { %803 = vmatpush.msra.mxu0 %v1138_v50  ;;  %630 = vmatpush.msra.mxu2 %v619_v55  ;;  %v1206_v55 = vld [vmem:[#allocation2 + $0x3a] sm:$0xff] }
  0x58   :  { %540 = vmatpush.msra.mxu1 %v531_v54  ;;  %721 = vmatpush.msrb.mxu3 %v706_v27  ;;  %v790_v54 = vld [vmem:[#allocation6 + $0x418] sm:$0xff] }
  0x59   :  { %804 = vmatpush.msra.mxu0 %v1140_v57  ;;  %631 = vmatpush.msra.mxu2 %v618_v61  ;;  %v690_v27 = vld [vmem:[#allocation2 + $0x33] sm:$0xff] }
  0x5a   :  { %541 = vmatpush.msra.mxu1 %v530_v60  ;;  %722 = vmatpush.msrb.mxu3 %v705_v53  ;;  %v689_v60 = vld [vmem:[#allocation2 + $0x2b] sm:$0xff] }
  0x5b   :  { %805 = vmatpush.msra.mxu0 %v1146_v24  ;;  %632 = vmatpush.msra.mxu2 %v617_v1  ;;  %v777_v53 = vld [vmem:[#allocation2 + $0x24] sm:$0xff] }
  0x5c   :  { %291 = vmatmul.f32.gmra.mxu2 %v1143_v62  ;;  %542 = vmatpush.msra.mxu1 %v529_v0 }
  0x5d   :  { %213 = vmatmul.f32.gmra.mxu1 %v60_v40  ;;  %806 = vmatpush.msra.mxu0 %v1149_v63  ;;  %v1162_v40 = vld [vmem:[#allocation2 + $0x1a] sm:$0xff] }
  0x5e   :  { %466 = vmatmul.f32.gmra.mxu0 %v1143_v62  ;;  %386 = vmatmul.f32.gmra.mxu3 %v1119_v4  ;;  %v702_v4 = vld [vmem:[#allocation6 + $0x3a0] sm:$0xff] }
  0x5f   :  { %807 = vmatpush.msra.mxu0 %v1155_v2  ;;  %543 = vmatpush.msra.mxu1 %v528_v3 }
  0x60   :  { %633 = vmatpush.msra.mxu2 %v616_v5  ;;  %723 = vmatpush.msrb.mxu3 %v704_v6 }
  0x61   :  { %808 = vmatpush.msra.mxu0 %v1160_v11  ;;  %544 = vmatpush.msra.mxu1 %v527_v38 }
  0x62   :  { %724 = vmatpush.msrb.mxu3 %v703_v12  ;;  %634 = vmatpush.msra.mxu2 %v615_v13  ;;  %v57_v12 = vld [vmem:[#allocation3 + $0x68] sm:$0xff] }
  0x63   :  { %809 = vmatpush.msra.mxu0 %v1166_v14  ;;  %545 = vmatpush.msra.mxu1 %v526_v21  ;;  %v71_v13 = vmax.f32 %v57_v12, 0.0 }
  0x64   :  { %294 = vmatmul.f32.gmra.mxu2 %v1162_v40  ;;  %725 = vmatpush.msrb.mxu3 %v702_v4 }
  0x65   :  { %216 = vmatmul.f32.gmra.mxu1 %v61_v51  ;;  %635 = vmatpush.msra.mxu2 %v614_v25  ;;  %v524_v51 = vld [vmem:[#allocation6 + $0x2a0] sm:$0xff]  ;;  %85 = vst [vmem:[#allocation2 + $0x68] sm:$0xff] %v71_v13 }
  0x66   :  { %469 = vmatmul.f32.gmra.mxu0 %v1162_v40  ;;  %389 = vmatmul.f32.gmra.mxu3 %v1125_v36  ;;  %v70_v36 = vmax.f32 %v56_v39, 0.0 }
  0x67   :  { %810 = vmatpush.msra.mxu0 %v1171_v28  ;;  %546 = vmatpush.msra.mxu1 %v525_v29  ;;  %v693_v29 = vld [vmem:[#allocation2 + $0x4b] sm:$0xff] }
  0x68   :  { %636 = vmatpush.msra.mxu2 %v613_v30  ;;  %726 = vmatpush.msrb.mxu3 %v701_v31  ;;  %84 = vst [vmem:[#allocation2 + $0x60] sm:$0xff] %v70_v36  ;;  %v694_v36 = vld [vmem:[#allocation2 + $0x53] sm:$0xff] }
  0x69   :  { %811 = vmatpush.msra.mxu0 %v1176_v33  ;;  %547 = vmatpush.msra.mxu1 %v524_v51 }
  0x6a   :  { %637 = vmatpush.msra.mxu2 %v612_v41  ;;  %727 = vmatpush.msrb.mxu3 %v700_v42  ;;  %v780_v41 = vld [vmem:[#allocation2 + $0x3c] sm:$0xff] }
  0x6b   :  { %812 = vmatpush.msra.mxu0 %v1186_v43  ;;  %548 = vmatpush.msra.mxu1 %v523_v44 }
  0x6c   :  { %297 = vmatmul.f32.gmra.mxu2 %v1178_v49 }
  0x6d   :  { %219 = vmatmul.f32.gmra.mxu1 %v62_v9  ;;  %638 = vmatpush.msra.mxu2 %v611_v7  ;;  %v699_v9 = vld [vmem:[#allocation6 + $0x388] sm:$0xff] }
  0x6e   :  { %472 = vmatmul.f32.gmra.mxu0 %v1178_v49  ;;  %392 = vmatmul.f32.gmra.mxu3 %v1131_v59  ;;  %v698_v59 = vld [vmem:[#allocation6 + $0x380] sm:$0xff] }
  0x6f   :  { %728 = vmatpush.msrb.mxu3 %v699_v9  ;;  %813 = vmatpush.msra.mxu0 %v792_v46 }
  0x70   :  { %549 = vmatpush.msra.mxu1 %v522_v23  ;;  %639 = vmatpush.msra.mxu2 %v610_v26  ;;  %v781_v26 = vld [vmem:[#allocation2 + $0x44] sm:$0xff] }
  0x71   :  { %814 = vmatpush.msra.mxu0 %v791_v47  ;;  %729 = vmatpush.msrb.mxu3 %v698_v59 }
  0x72   :  { %550 = vmatpush.msra.mxu1 %v521_v8 }
  0x73   :  { %927 = vmatpush.msra.mxu3 %v1138_v50  ;;  %815 = vmatpush.msra.mxu0 %v790_v54  ;;  %v687_v50 = vld [vmem:[#allocation2 + $0x1b] sm:$0xff] }
  0x74   :  { %300 = vmatmul.f32.gmra.mxu2 %v1188_v45 }
  0x75   :  { %222 = vmatmul.f32.gmra.mxu1 %v63_v10  ;;  %928 = vmatpush.msra.mxu3 %v1140_v57  ;;  %v609_v10 = vld [vmem:[#allocation6 + $0x300] sm:$0xff] }
  0x76   :  { %475 = vmatmul.f32.gmra.mxu0 %v1188_v45  ;;  %395 = vmatmul.f32.gmra.mxu3 %v1115_v56  ;;  %v520_v56 = vld [vmem:[#allocation6 + $0x280] sm:$0xff] }
  0x77   :  { %929 = vmatpush.msra.mxu3 %v1146_v24  ;;  %640 = vmatpush.msra.mxu2 %v609_v10  ;;  %v688_v57 = vld [vmem:[#allocation2 + $0x23] sm:$0xff] }
  0x78   :  { %551 = vmatpush.msra.mxu1 %v520_v56  ;;  %816 = vmatpush.msra.mxu0 %v789_v20  ;;  %v776_v24 = vld [vmem:[#allocation2 + $0x1c] sm:$0xff] }
  0x79   :  { %930 = vmatpush.msra.mxu3 %v1149_v63 }
  0x7b   :  { %931 = vmatpush.msra.mxu3 %v1155_v2  ;;  %v691_v2 = vld [vmem:[#allocation2 + $0x3b] sm:$0xff] }
  0x7c   :  { %303 = vmatmul.f32.gmra.mxu2 %v1196_v48 }
  0x7d   :  { %225 = vmatmul.f32.gmra.mxu1 %v64_v22  ;;  %932 = vmatpush.msra.mxu3 %v1160_v11  ;;  %v1217_v22 = vld [vmem:[#allocation2 + $0x42] sm:$0xff]  ;;  %v778_v11 = vld [vmem:[#allocation2 + $0x2c] sm:$0xff] }
  0x7e   :  { %478 = vmatmul.f32.gmra.mxu0 %v1196_v48  ;;  %398 = vmatmul.f32.gmra.mxu3 %v1122_v17  ;;  %v788_v17 = vld [vmem:[#allocation6 + $0x408] sm:$0xff] }
  0x7f   :  { %933 = vmatpush.msra.mxu3 %v1166_v14  ;;  %817 = vmatpush.msra.mxu0 %v788_v17 }
  0x81   :  { %934 = vmatpush.msra.mxu3 %v1171_v28  ;;  %818 = vmatpush.msra.mxu0 %v787_v35  ;;  %v779_v28 = vld [vmem:[#allocation2 + $0x34] sm:$0xff] }
  0x83   :  { %935 = vmatpush.msra.mxu3 %v1176_v33 }
  0x84   :  { %306 = vmatmul.f32.gmra.mxu2 %v1206_v55 }
  0x85   :  { %228 = vmatmul.f32.gmra.mxu1 %v65_v37  ;;  %v340_v37 = vld [vmem:[#allocation2 + $0x59] sm:$0xff]  ;;  %936 = vmatpush.msra.mxu3 %v1186_v43 }
  0x86   :  { %481 = vmatmul.f32.gmra.mxu0 %v1206_v55  ;;  %401 = vmatmul.f32.gmra.mxu3 %v1128_v52  ;;  %v1227_v52 = vld [vmem:[#allocation2 + $0x4a] sm:$0xff] }
  0x87   :  { %937 = vmatpush.msra.mxu3 %v792_v46 }
  0x89   :  { %938 = vmatpush.msra.mxu3 %v791_v47 }
  0x8b   :  { %939 = vmatpush.msra.mxu3 %v790_v54 }
  0x8c   :  { %309 = vmatmul.f32.gmra.mxu2 %v1217_v22 }
  0x8d   :  { %231 = vmatmul.f32.gmra.mxu1 %v66_v18  ;;  %940 = vmatpush.msra.mxu3 %v789_v20  ;;  %v1233_v18 = vld [vmem:[#allocation2 + $0x52] sm:$0xff] }
  0x8e   :  { %484 = vmatmul.f32.gmra.mxu0 %v1217_v22  ;;  %404 = vmatmul.f32.gmra.mxu3 %v340_v37  ;;  %v696_v37 = vld [vmem:[#allocation2 + $0x63] sm:$0xff] }
  0x8f   :  { %941 = vmatpush.msra.mxu3 %v788_v17 }
  0x91   :  { %942 = vmatpush.msra.mxu3 %v787_v35 }
  0x94   :  { %312 = vmatmul.f32.gmra.mxu2 %v1227_v52 }
  0x95   :  { %234 = vmatmul.f32.gmra.mxu1 %v67_v19  ;;  %v1240_v19 = vld [vmem:[#allocation2 + $0x5a] sm:$0xff] }
  0x96   :  { %487 = vmatmul.f32.gmra.mxu0 %v1227_v52  ;;  %730 = vmatmul.f32.vlgmr.msrb.gmra.mxu3 %v686_v15 }
  0x9c   :  { %315 = vmatmul.f32.gmra.mxu2 %v1233_v18 }
  0x9d   :  { %237 = vmatmul.f32.gmra.mxu1 %v68_v34 }
  0x9e   :  { %490 = vmatmul.f32.gmra.mxu0 %v1233_v18  ;;  %733 = vmatmul.f32.gmra.mxu3 %v687_v50 }
  0xa4   :  { %641 = vmatmul.f32.vlgmr.msra.gmra.mxu2 %v1143_v62 }
  0xa5   :  { %552 = vmatmul.f32.vlgmr.msra.gmra.mxu1 %v508_v16 }
  0xa6   :  { %493 = vmatmul.f32.gmra.mxu0 %v1240_v19  ;;  %736 = vmatmul.f32.gmra.mxu3 %v688_v57 }
  0xa9   :  { %v1243_v58 = vpop.f32.mrf.mxu1 }
  0xac   :  { %644 = vmatmul.f32.gmra.mxu2 %v1162_v40  ;;  %v692_v40 = vld [vmem:[#allocation2 + $0x43] sm:$0xff] }
  0xad   :  { %555 = vmatmul.f32.gmra.mxu1 %v686_v15  ;;  %v158_v34 = vpop.f32.mrf.mxu0 }
  0xae   :  { %819 = vmatmul.f32.vlgmr.msra.gmra.mxu0 %v775_v32  ;;  %739 = vmatmul.f32.gmra.mxu3 %v689_v60 }
  0xaf   :  { %v1246_v61 = vpop.f32.mrf.mxu2 }
  0xb2   :  { %v1248_v62 = vpop.f32.mrf.mxu1 }
  0xb3   :  { %v375_v3 = vpop.f32.mrf.mxu3 }
  0xb4   :  { %647 = vmatmul.f32.gmra.mxu2 %v1178_v49 }
  0xb5   :  { %558 = vmatmul.f32.gmra.mxu1 %v687_v50 }
  0xb6   :  { %822 = vmatmul.f32.gmra.mxu0 %v776_v24  ;;  %v161_v63 = vpop.f32.mrf.mxu0  ;;  %742 = vmatmul.f32.gmra.mxu3 %v690_v27  ;;  %v785_v24 = vld [vmem:[#allocation2 + $0x64] sm:$0xff] }
  0xb7   :  { %v1253_v1 = vpop.f32.mrf.mxu2 }
  0xba   :  { %v1251_v0 = vpop.f32.mrf.mxu1 }
  0xbc   :  { %650 = vmatmul.f32.gmra.mxu2 %v1188_v45 }
  0xbd   :  { %561 = vmatmul.f32.gmra.mxu1 %v688_v57 }
  0xbe   :  { %825 = vmatmul.f32.gmra.mxu0 %v777_v53  ;;  %745 = vmatmul.f32.gmra.mxu3 %v691_v2  ;;  %v378_v21 = vpop.f32.mrf.mxu3  ;;  %v607_v53 = vld [vmem:[#allocation2 + $0x62] sm:$0xff] }
  0xbf   :  { %v164_v6 = vpop.f32.mrf.mxu0 }
  0xc2   :  { %v1256_v5 = vpop.f32.mrf.mxu1 }
  0xc3   :  { %v1259_v38 = vpop.f32.mrf.mxu2 }
  0xc4   :  { %653 = vmatmul.f32.gmra.mxu2 %v1196_v48  ;;  %v695_v48 = vld [vmem:[#allocation2 + $0x5b] sm:$0xff] }
  0xc5   :  { %564 = vmatmul.f32.gmra.mxu1 %v689_v60 }
  0xc6   :  { %828 = vmatmul.f32.gmra.mxu0 %v778_v11  ;;  %748 = vmatmul.f32.gmra.mxu3 %v692_v40 }
  0xc8   :  { %v167_v4 = vpop.f32.mrf.mxu0 }
  0xca   :  { %v208_v14 = vpop.f32.mrf.mxu1  ;;  %v381_v42 = vpop.f32.mrf.mxu3 }
  0xcb   :  { %v209_v25 = vadd.f32 %v208_v14, %v158_v34  ;;  %v783_v34 = vld [vmem:[#allocation2 + $0x54] sm:$0xff] }
  0xcc   :  { %656 = vmatmul.f32.gmra.mxu2 %v1206_v55 }
  0xcd   :  { %567 = vmatmul.f32.gmra.mxu1 %v690_v27 }
  0xce   :  { %831 = vmatmul.f32.gmra.mxu0 %v779_v28  ;;  %751 = vmatmul.f32.gmra.mxu3 %v693_v29 }
  0xcf   :  { %v286_v30 = vpop.f32.mrf.mxu2 }
  0xd0   :  { %v319_v31 = vadd.f32 %v286_v30, %v209_v25 }
  0xd2   :  { %v211_v33 = vpop.f32.mrf.mxu1  ;;  %v408_v49 = vadd.f32 %v375_v3, %v319_v31 }
  0xd3   :  { %v212_v51 = vadd.f32 %v211_v33, %v161_v63  ;;  %v464_v39 = vpop.f32.mrf.mxu0 }
  0xd4   :  { %659 = vmatmul.f32.gmra.mxu2 %v1217_v22  ;;  %v1263_v43 = vadd.f32 %v464_v39, %v408_v49  ;;  %v384_v59 = vpop.f32.mrf.mxu3  ;;  %v782_v22 = vld [vmem:[#allocation2 + $0x4c] sm:$0xff] }
  0xd5   :  { %570 = vmatmul.f32.gmra.mxu1 %v691_v2 }
  0xd6   :  { %834 = vmatmul.f32.gmra.mxu0 %v780_v41  ;;  %754 = vmatmul.f32.gmra.mxu3 %v694_v36 }
  0xd7   :  { %v289_v44 = vpop.f32.mrf.mxu2 }
  0xd8   :  { %v320_v45 = vadd.f32 %v289_v44, %v212_v51 }
  0xda   :  { %v214_v7 = vpop.f32.mrf.mxu1  ;;  %v409_v9 = vadd.f32 %v378_v21, %v320_v45 }
  0xdb   :  { %v215_v46 = vadd.f32 %v214_v7, %v164_v6  ;;  %v467_v23 = vpop.f32.mrf.mxu0 }
  0xdc   :  { %662 = vmatmul.f32.gmra.mxu2 %v1227_v52  ;;  %v1266_v47 = vadd.f32 %v467_v23, %v409_v9 }
  0xdd   :  { %573 = vmatmul.f32.gmra.mxu1 %v692_v40 }
  0xde   :  { %837 = vmatmul.f32.gmra.mxu0 %v781_v26  ;;  %757 = vmatmul.f32.gmra.mxu3 %v695_v48 }
  0xdf   :  { %v292_v8 = vpop.f32.mrf.mxu2 }
  0xe0   :  { %v321_v10 = vadd.f32 %v292_v8, %v215_v46 }
  0xe1   :  { %v387_v17 = vpop.f32.mrf.mxu3 }
  0xe2   :  { %v217_v54 = vpop.f32.mrf.mxu1  ;;  %v410_v56 = vadd.f32 %v381_v42, %v321_v10 }
  0xe3   :  { %v218_v55 = vadd.f32 %v217_v54, %v167_v4  ;;  %v470_v20 = vpop.f32.mrf.mxu0 }
  0xe4   :  { %665 = vmatmul.f32.gmra.mxu2 %v1233_v18  ;;  %v1269_v35 = vadd.f32 %v470_v20, %v410_v56 }
  0xe5   :  { %576 = vmatmul.f32.gmra.mxu1 %v693_v29 }
  0xe6   :  { %840 = vmatmul.f32.gmra.mxu0 %v782_v22  ;;  %760 = vmatmul.f32.gmra.mxu3 %v696_v37 }
  0xe7   :  { %v295_v52 = vpop.f32.mrf.mxu2 }
  0xe8   :  { %v322_v15 = vadd.f32 %v295_v52, %v218_v55 }
  0xe9   :  { %v390_v60 = vpop.f32.mrf.mxu3 }
  0xea   :  { %v220_v50 = vpop.f32.mrf.mxu1  ;;  %v411_v16 = vadd.f32 %v384_v59, %v322_v15 }
  0xeb   :  { %v221_v57 = vadd.f32 %v220_v50, %v1243_v58  ;;  %v473_v32 = vpop.f32.mrf.mxu0  ;;  %v784_v58 = vld [vmem:[#allocation2 + $0x5c] sm:$0xff] }
  0xec   :  { %668 = vmatmul.f32.gmra.mxu2 %v1240_v19  ;;  %v1273_v18 = vadd.f32 %v473_v32, %v411_v16 }
  0xed   :  { %579 = vmatmul.f32.gmra.mxu1 %v694_v36 }
  0xee   :  { %843 = vmatmul.f32.gmra.mxu0 %v783_v34  ;;  %849 = vmatmul.f32.vlgmr.msra.gmra.mxu3 %v785_v24 }
  0xef   :  { %v298_v27 = vpop.f32.mrf.mxu2 }
  0xf0   :  { %v323_v63 = vadd.f32 %v298_v27, %v221_v57 }
  0xf1   :  { %v393_v40 = vpop.f32.mrf.mxu3 }
  0xf2   :  { %v223_v2 = vpop.f32.mrf.mxu1  ;;  %v412_v3 = vadd.f32 %v387_v17, %v323_v63 }
  0xf3   :  { %v224_v6 = vadd.f32 %v223_v2, %v1248_v62  ;;  %v476_v11 = vpop.f32.mrf.mxu0 }
  0xf4   :  { %671 = vmatmul.f32.gmra.mxu2 %v607_v53  ;;  %v1276_v19 = vadd.f32 %v476_v11, %v412_v3 }
  0xf5   :  { %582 = vmatmul.f32.gmra.mxu1 %v695_v48 }
  0xf6   :  { %846 = vmatmul.f32.gmra.mxu0 %v784_v58 }
  0xf7   :  { %v301_v12 = vpop.f32.mrf.mxu2 }
  0xf8   :  { %v324_v13 = vadd.f32 %v301_v12, %v224_v6 }
  0xf9   :  { %v396_v28 = vpop.f32.mrf.mxu3 }
  0xfa   :  { %v226_v14 = vpop.f32.mrf.mxu1  ;;  %v413_v21 = vadd.f32 %v390_v60, %v324_v13 }
  0xfb   :  { %v227_v25 = vadd.f32 %v226_v14, %v1251_v0  ;;  %v479_v4 = vpop.f32.mrf.mxu0 }
  0xfc   :  { %v1279_v29 = vadd.f32 %v479_v4, %v413_v21 }
  0xff   :  { %v304_v30 = vpop.f32.mrf.mxu2 }
 0x100   :  { %v325_v62 = vadd.f32 %v304_v30, %v227_v25 }
 0x101   :  { %v399_v39 = vpop.f32.mrf.mxu3 }
 0x102   :  { %v229_v31 = vpop.f32.mrf.mxu1  ;;  %v414_v33 = vadd.f32 %v393_v40, %v325_v62 }
 0x103   :  { %v230_v49 = vadd.f32 %v229_v31, %v1256_v5  ;;  %v482_v51 = vpop.f32.mrf.mxu0 }
 0x104   :  { %v1282_v41 = vadd.f32 %v482_v51, %v414_v33 }
 0x107   :  { %v307_v42 = vpop.f32.mrf.mxu2 }
 0x108   :  { %v326_v36 = vadd.f32 %v307_v42, %v230_v49 }
 0x109   :  { %v402_v0 = vpop.f32.mrf.mxu3 }
 0x10a   :  { %v232_v44 = vpop.f32.mrf.mxu1  ;;  %v415_v45 = vadd.f32 %v396_v28, %v326_v36 }
 0x10b   :  { %v485_v7 = vpop.f32.mrf.mxu0  ;;  %v233_v46 = vadd.f32 %v232_v44, %v1246_v61 }
 0x10c   :  { %v1284_v9 = vadd.f32 %v485_v7, %v415_v45 }
 0x10f   :  { %v310_v23 = vpop.f32.mrf.mxu2 }
 0x110   :  { %v327_v26 = vadd.f32 %v310_v23, %v233_v46 }
 0x111   :  { %v405_v5 = vpop.f32.mrf.mxu3 }
 0x112   :  { %v235_v59 = vpop.f32.mrf.mxu1  ;;  %v416_v48 = vadd.f32 %v399_v39, %v327_v26 }
 0x113   :  { %v488_v8 = vpop.f32.mrf.mxu0  ;;  %v236_v54 = vadd.f32 %v235_v59, %v1253_v1 }
 0x114   :  { %v1287_v10 = vadd.f32 %v488_v8, %v416_v48 }
 0x117   :  { %v313_v56 = vpop.f32.mrf.mxu2 }
 0x118   :  { %v328_v55 = vadd.f32 %v313_v56, %v236_v54 }
 0x119   :  { %v731_v37 = vpop.f32.mrf.mxu3 }
 0x11a   :  { %v238_v20 = vpop.f32.mrf.mxu1  ;;  %v417_v22 = vadd.f32 %v402_v0, %v328_v55 }
 0x11b   :  { %v491_v17 = vpop.f32.mrf.mxu0  ;;  %v239_v61 = vadd.f32 %v238_v20, %v1259_v38 }
 0x11c   :  { %v1290_v52 = vadd.f32 %v491_v17, %v417_v22 }
 0x11f   :  { %v316_v15 = vpop.f32.mrf.mxu2 }
 0x120   :  { %v329_v50 = vadd.f32 %v316_v15, %v239_v61 }
 0x121   :  { %v734_v34 = vpop.f32.mrf.mxu3 }
 0x122   :  { %v553_v16 = vpop.f32.mrf.mxu1  ;;  %v418_v57 = vadd.f32 %v405_v5, %v329_v50 }
 0x123   :  { %v494_v32 = vpop.f32.mrf.mxu0  ;;  %v586_v1 = vadd.f32 %v553_v16, %v1263_v43 }
 0x124   :  { %v1293_v60 = vadd.f32 %v494_v32, %v418_v57 }
 0x127   :  { %v642_v24 = vpop.f32.mrf.mxu2 }
 0x128   :  { %v675_v27 = vadd.f32 %v642_v24, %v586_v1 }
 0x129   :  { %v737_v3 = vpop.f32.mrf.mxu3 }
 0x12a   :  { %v556_v63 = vpop.f32.mrf.mxu1  ;;  %v764_v53 = vadd.f32 %v731_v37, %v675_v27 }
 0x12b   :  { %v820_v2 = vpop.f32.mrf.mxu0  ;;  %v587_v11 = vadd.f32 %v556_v63, %v1266_v47 }
 0x12c   :  { %v853_v6 = vadd.f32 %v820_v2, %v764_v53 }
 0x12e   :  { %864 = vst [vmem:[#allocation8] sm:$0xff] %v853_v6 }
 0x12f   :  { %v645_v38 = vpop.f32.mrf.mxu2 }
 0x130   :  { %v676_v58 = vadd.f32 %v645_v38, %v587_v11 }
 0x131   :  { %v740_v14 = vpop.f32.mrf.mxu3 }
 0x132   :  { %v559_v40 = vpop.f32.mrf.mxu1  ;;  %v765_v12 = vadd.f32 %v734_v34, %v676_v58 }
 0x133   :  { %v823_v13 = vpop.f32.mrf.mxu0  ;;  %v588_v25 = vadd.f32 %v559_v40, %v1269_v35 }
 0x134   :  { %v854_v21 = vadd.f32 %v823_v13, %v765_v12 }
 0x136   :  { %865 = vst [vmem:[#allocation8 + $0x8] sm:$0xff] %v854_v21 }
 0x137   :  { %v648_v43 = vpop.f32.mrf.mxu2 }
 0x138   :  { %v677_v4 = vadd.f32 %v648_v43, %v588_v25 }
 0x139   :  { %v743_v31 = vpop.f32.mrf.mxu3 }
 0x13a   :  { %v562_v28 = vpop.f32.mrf.mxu1  ;;  %v766_v30 = vadd.f32 %v737_v3, %v677_v4 }
 0x13b   :  { %v826_v62 = vpop.f32.mrf.mxu0  ;;  %v589_v47 = vadd.f32 %v562_v28, %v1273_v18 }
 0x13c   :  { %v855_v33 = vadd.f32 %v826_v62, %v766_v30 }
 0x13e   :  { %866 = vst [vmem:[#allocation8 + $0x10] sm:$0xff] %v855_v33 }
 0x13f   :  { %v651_v49 = vpop.f32.mrf.mxu2 }
 0x140   :  { %v678_v51 = vadd.f32 %v651_v49, %v589_v47 }
 0x141   :  { %v746_v44 = vpop.f32.mrf.mxu3 }
 0x142   :  { %v565_v39 = vpop.f32.mrf.mxu1  ;;  %v767_v42 = vadd.f32 %v740_v14, %v678_v51 }
 0x143   :  { %v829_v36 = vpop.f32.mrf.mxu0  ;;  %v590_v35 = vadd.f32 %v565_v39, %v1276_v19 }
 0x144   :  { %v856_v45 = vadd.f32 %v829_v36, %v767_v42 }
 0x146   :  { %867 = vst [vmem:[#allocation8 + $0x18] sm:$0xff] %v856_v45 }
 0x147   :  { %v654_v7 = vpop.f32.mrf.mxu2 }
 0x148   :  { %v679_v0 = vadd.f32 %v654_v7, %v590_v35 }
 0x149   :  { %v749_v59 = vpop.f32.mrf.mxu3 }
 0x14a   :  { %v568_v46 = vpop.f32.mrf.mxu1  ;;  %v768_v23 = vadd.f32 %v743_v31, %v679_v0 }
 0x14b   :  { %v832_v26 = vpop.f32.mrf.mxu0  ;;  %v591_v18 = vadd.f32 %v568_v46, %v1279_v29 }
 0x14c   :  { %v857_v48 = vadd.f32 %v832_v26, %v768_v23 }
 0x14e   :  { %868 = vst [vmem:[#allocation8 + $0x20] sm:$0xff] %v857_v48 }
 0x14f   :  { %v657_v8 = vpop.f32.mrf.mxu2 }
 0x150   :  { %v680_v5 = vadd.f32 %v657_v8, %v591_v18 }
 0x151   :  { %v752_v20 = vpop.f32.mrf.mxu3 }
 0x152   :  { %v571_v54 = vpop.f32.mrf.mxu1  ;;  %v769_v56 = vadd.f32 %v746_v44, %v680_v5 }
 0x153   :  { %v835_v55 = vpop.f32.mrf.mxu0  ;;  %v592_v19 = vadd.f32 %v571_v54, %v1282_v41 }
 0x154   :  { %v858_v22 = vadd.f32 %v835_v55, %v769_v56 }
 0x156   :  { %869 = vst [vmem:[#allocation8 + $0x28] sm:$0xff] %v858_v22 }
 0x157   :  { %v660_v17 = vpop.f32.mrf.mxu2 }
 0x158   :  { %v681_v37 = vadd.f32 %v660_v17, %v592_v19 }
 0x159   :  { %v755_v16 = vpop.f32.mrf.mxu3 }
 0x15a   :  { %v574_v61 = vpop.f32.mrf.mxu1  ;;  %v770_v15 = vadd.f32 %v749_v59, %v681_v37 }
 0x15b   :  { %v838_v50 = vpop.f32.mrf.mxu0  ;;  %v593_v29 = vadd.f32 %v574_v61, %v1284_v9 }
 0x15c   :  { %v859_v57 = vadd.f32 %v838_v50, %v770_v15 }
 0x15e   :  { %870 = vst [vmem:[#allocation8 + $0x30] sm:$0xff] %v859_v57 }
 0x15f   :  { %v663_v32 = vpop.f32.mrf.mxu2 }
 0x160   :  { %v682_v34 = vadd.f32 %v663_v32, %v593_v29 }
 0x161   :  { %v758_v53 = vpop.f32.mrf.mxu3 }
 0x162   :  { %v577_v1 = vpop.f32.mrf.mxu1  ;;  %v771_v24 = vadd.f32 %v752_v20, %v682_v34 }
 0x163   :  { %v841_v27 = vpop.f32.mrf.mxu0  ;;  %v594_v41 = vadd.f32 %v577_v1, %v1287_v10 }
 0x164   :  { %v860_v63 = vadd.f32 %v841_v27, %v771_v24 }
 0x166   :  { %871 = vst [vmem:[#allocation8 + $0x38] sm:$0xff] %v860_v63 }
 0x167   :  { %v666_v2 = vpop.f32.mrf.mxu2 }
 0x168   :  { %v683_v3 = vadd.f32 %v666_v2, %v594_v41 }
 0x169   :  { %v761_v12 = vpop.f32.mrf.mxu3 }
 0x16a   :  { %v580_v6 = vpop.f32.mrf.mxu1  ;;  %v772_v11 = vadd.f32 %v755_v16, %v683_v3 }
 0x16b   :  { %v844_v38 = vpop.f32.mrf.mxu0  ;;  %v595_v40 = vadd.f32 %v580_v6, %v1290_v52 }
 0x16c   :  { %v861_v58 = vadd.f32 %v844_v38, %v772_v11 }
 0x16e   :  { %872 = vst [vmem:[#allocation8 + $0x40] sm:$0xff] %v861_v58 }
 0x16f   :  { %v669_v9 = vpop.f32.mrf.mxu2 }
 0x170   :  { %v684_v13 = vadd.f32 %v669_v9, %v595_v40 }
 0x171   :  { %v850_v30 = vpop.f32.mrf.mxu3 }
 0x172   :  { %v773_v14 = vadd.f32 %v758_v53, %v684_v13  ;;  %v583_v21 = vpop.f32.mrf.mxu1 }
 0x173   :  { %v847_v25 = vpop.f32.mrf.mxu0  ;;  %v596_v4 = vadd.f32 %v583_v21, %v1293_v60 }
 0x174   :  { %v862_v43 = vadd.f32 %v847_v25, %v773_v14 }
 0x176   :  { %873 = vst [vmem:[#allocation8 + $0x48] sm:$0xff] %v862_v43 }
 0x177   :  { %v672_v10 = vpop.f32.mrf.mxu2 }
 0x178   :  { %v685_v28 = vadd.f32 %v672_v10, %v596_v4 }
 0x17a   :  { %v774_v52 = vadd.f32 %v761_v12, %v685_v28 }
 0x17c   :  { %v863_v62 = vadd.f32 %v850_v30, %v774_v52 }
 0x17e   :  { %874 = vst [vmem:[#allocation8 + $0x50] sm:$0xff] %v863_v62 }
 0x17f   :  { %887 = dma.vmem_to_hbm [thread:$0]  %s880_s1, 1408, %s882_s23, [#allocation5], %s1027_s17, %s1027_s17, %s1028_s18  }
 0x180   :  { %1024 = dma.done.wait [#allocation5], 1408  }
 0x181   :  { %1025 = vsyncadd [#allocation5], 4294965888 }
 0x182   :  { %892 = vsyncpa [#allocation4], 1 }
 0x183   :  { %893 = vsyncpa [#allocation7], 1 }
 0x184   :  { %894 = vsyncpa [#allocation5], 1 }

</bundles_post_ra>
